<compile_context>
chip_gen: v7x
topology: tpu7x:2x2x1
jax: 0.10.0
libtpu: 0.0.40
codegen_flags: <defaults>
</compile_context>

<pallas_src>
import jax
import jax.numpy as jnp
from jax.experimental import pallas as pl
from jax.experimental.pallas import tpu as pltpu

LANES = 128


def linear_kernel(w_ref, b_ref, x_ref, o_ref):
    # w_ref / b_ref: (1,) f32 scalars in SMEM.
    # x_ref / o_ref: (tile_rows, 128) VMEM tiles (last grid block may be partial;
    # its out-of-bounds rows are masked on store, so garbage reads are harmless).
    x = x_ref[...].astype(jnp.float32)
    o_ref[...] = (x * w_ref[0] + b_ref[0]).astype(o_ref.dtype)


def _align_up(v, a):
    return -(-v // a) * a


def linear_1x1(x, weight, bias, *, min_pallas_elems=65536, max_tile_rows=4096,
               donate_slab=False):
    """x: (B, 1), weight: (1, 1), bias: (1,) -> (B, 1) = x @ W^T + b."""
    B, F = x.shape
    assert F == 1 and weight.shape == (1, 1) and bias.shape == (1,)

    # Parameters stay f32 (PyTorch Linear keeps f32 params); compute in f32.
    w_scalar = weight.reshape(1).astype(jnp.float32)   # (1,)
    b_scalar = bias.reshape(1).astype(jnp.float32)     # (1,)

    n = B * F
    if n < min_pallas_elems:
        # Tiny batch: a pallas_call is pure launch/DMA overhead here; let XLA
        # fuse the (f32) scale-and-shift into surrounding ops.
        y = x.astype(jnp.float32) * w_scalar[0] + b_scalar[0]
        return y.astype(x.dtype)

    # ---- lane-dense slab: (B, 1) row-major -> flat (n,) -> (rows, 128) ----
    rows = pl.cdiv(n, LANES)
    n_pad = rows * LANES                 # pad by at most 127 elements
    flat = x.reshape(-1)                 # free view (row-major, contiguous)
    if n_pad != n:
        flat = jnp.pad(flat, (0, n_pad - n))
    slab = flat.reshape(rows, LANES)     # free view when n % 128 == 0

    # ---- tile-size selection (dtype-aware sublane alignment) ----
    itemsize = jnp.dtype(x.dtype).itemsize
    align = max(8, 32 // itemsize)       # 8 for f32, 16 for bf16, 32 for int8/fp8

    if rows <= align:
        tile_rows = rows                 # single block equal to full first dim
    else:
        tile_rows = min(max_tile_rows, _align_up(rows, align))
        # Cap so the "parallel" grid has >= 2 steps -> both v7x TensorCores work.
        tile_rows = min(tile_rows, _align_up(-(-rows // 2), align))
        tile_rows = max(tile_rows, align)

    num_tiles = pl.cdiv(rows, tile_rows)  # last block may be partial (masked)

    kwargs = {}
    if donate_slab:
        # Output reuses the slab's HBM buffer (only helps if x is donated).
        kwargs["input_output_aliases"] = {2: 0}

    out_slab = pl.pallas_call(
        linear_kernel,
        out_shape=jax.ShapeDtypeStruct((rows, LANES), x.dtype),
        grid=(num_tiles,),
        in_specs=[
            pl.BlockSpec(memory_space=pltpu.SMEM),               # weight scalar (f32)
            pl.BlockSpec(memory_space=pltpu.SMEM),               # bias scalar (f32)
            pl.BlockSpec((tile_rows, LANES), lambda i: (i, 0)),   # x tile
        ],
        out_specs=pl.BlockSpec((tile_rows, LANES), lambda i: (i, 0)),
        compiler_params=pltpu.CompilerParams(
            dimension_semantics=("parallel",),
        ),
        **kwargs,
    )(w_scalar, b_scalar, slab)

    out_flat = out_slab.reshape(-1)      # free view
    if n_pad != n:
        out_flat = out_flat[:n]          # only on ragged B (<=127 elems dropped)
    return out_flat.reshape(B, F)        # free view


if __name__ == "__main__":
    key = jax.random.PRNGKey(0)
    kx, kw, kb, kx2, kx3 = jax.random.split(key, 5)

    # Deterministic parameters mimicking nn.Linear(1, 1).
    weight = jax.random.uniform(kw, (1, 1), jnp.float32, -1.0, 1.0)
    bias = jax.random.uniform(kb, (1,), jnp.float32, -1.0, 1.0)

    # --- Case 1: tiny batch (B=8) — dispatcher uses the fused XLA path. ---
    x_small = jax.random.normal(kx, (8, 1), jnp.float32)
    out_small = linear_1x1(x_small, weight, bias)
    jax.block_until_ready(out_small)
    ref_small = x_small @ weight.T + bias
    assert jnp.allclose(out_small, ref_small, atol=1e-6)

    # --- Case 2: same tiny batch forced through the Pallas kernel
    #     (single padded (1, 128) lane-dense block). ---
    out_small_pl = linear_1x1(x_small, weight, bias, min_pallas_elems=0)
    jax.block_until_ready(out_small_pl)
    assert jnp.allclose(out_small_pl, ref_small, atol=1e-6)

    # --- Case 3: 128-aligned batch — zero-copy reshape path, grid split into
    #     2 parallel tiles (megacore-friendly), no pad/slice at all. ---
    B_aligned = 8192  # rows = 64 -> 2 tiles of 32 rows
    x_aligned = jax.random.normal(kx2, (B_aligned, 1), jnp.float32)
    out_aligned = linear_1x1(x_aligned, weight, bias, min_pallas_elems=0)
    jax.block_until_ready(out_aligned)
    ref_aligned = x_aligned @ weight.T + bias
    assert jnp.allclose(out_aligned, ref_aligned, atol=1e-6)

    # --- Case 4: ragged batch (not a multiple of 128) with a small tile so the
    #     multi-step pipeline, the <=127-element pad and the partial (masked)
    #     last grid block are all exercised. ---
    B_ragged = 50000  # 50000 elems -> 391 rows -> 4 tiles of 128 rows (last partial)
    x_ragged = jax.random.normal(kx3, (B_ragged, 1), jnp.float32)
    out_ragged = linear_1x1(x_ragged, weight, bias,
                            min_pallas_elems=0, max_tile_rows=128)
    jax.block_until_ready(out_ragged)
    ref_ragged = x_ragged @ weight.T + bias
    assert jnp.allclose(out_ragged, ref_ragged, atol=1e-6)

    print("KERNEL_OK")
</pallas_src>

<mosaic_0001>
module attributes {stable_mosaic.version = 11 : i64} {
  func.func @linear_kernel(%arg0: i32, %arg1: memref<1xf32, #tpu.memory_space<smem>>, %arg2: memref<1xf32, #tpu.memory_space<smem>>, %arg3: memref<1x128xf32, #tpu.memory_space<vmem>>, %arg4: memref<1x128xf32, #tpu.memory_space<vmem>>) attributes {dimension_semantics = [#tpu.dimension_semantics<parallel>], iteration_bounds = array<i64: 1>, scalar_prefetch = 0 : i64, scratch_operands = 0 : i64, tpu.core_type = #tpu.core_type<tc>, window_params = [{transform_indices = @transform_0, window_bounds = array<i64: 1>}, {transform_indices = @transform_1, window_bounds = array<i64: 1>}, {transform_indices = @transform_2, window_bounds = array<i64: 1, 128>}, {transform_indices = @transform_3, window_bounds = array<i64: 1, 128>}]} {
    %c0 = arith.constant 0 : index
    %c0_0 = arith.constant 0 : index
    %0 = vector.load %arg3[%c0, %c0_0] : memref<1x128xf32, #tpu.memory_space<vmem>>, vector<1x128xf32>
    %c0_1 = arith.constant 0 : index
    %1 = memref.load %arg1[%c0_1] : memref<1xf32, #tpu.memory_space<smem>>
    %2 = vector.broadcast %1 : f32 to vector<1x128xf32>
    %3 = arith.mulf %0, %2 : vector<1x128xf32>
    %c0_2 = arith.constant 0 : index
    %4 = memref.load %arg2[%c0_2] : memref<1xf32, #tpu.memory_space<smem>>
    %5 = vector.broadcast %4 : f32 to vector<1x128xf32>
    %6 = arith.addf %3, %5 : vector<1x128xf32>
    %c0_3 = arith.constant 0 : index
    %c0_4 = arith.constant 0 : index
    %7 = vector.load %arg4[%c0_3, %c0_4] : memref<1x128xf32, #tpu.memory_space<vmem>>, vector<1x128xf32>
    tpu.vector_store %arg4[%c0_3, %c0_4], %6 {strides = array<i32>} : memref<1x128xf32, #tpu.memory_space<vmem>>, vector<1x128xf32>,
    return
  }
  func.func @transform_0(%arg0: i32) -> i32 {
    %c0_i32 = arith.constant 0 : i32
    %c0_i32_0 = arith.constant 0 : i32
    return %c0_i32 : i32
  }
  func.func @transform_1(%arg0: i32) -> i32 {
    %c0_i32 = arith.constant 0 : i32
    %c0_i32_0 = arith.constant 0 : i32
    return %c0_i32 : i32
  }
  func.func @transform_2(%arg0: i32) -> (i32, i32) {
    %c0_i32 = arith.constant 0 : i32
    %c0_i32_0 = arith.constant 0 : i32
    return %arg0, %c0_i32 : i32, i32
  }
  func.func @transform_3(%arg0: i32) -> (i32, i32) {
    %c0_i32 = arith.constant 0 : i32
    %c0_i32_0 = arith.constant 0 : i32
    return %arg0, %c0_i32 : i32, i32
  }
}

</mosaic_0001>

<bundles_post_ra>
// kernel: tpu_custom_call.1
= control target key start
LH: loop header
LB: loop body
LE: loop exit
PB: predicated region body
PF: predicated region fallthrough
CT: control target
= control target key end

     0   :  { %s106_s0 = inlined_call_operand.<no memory space> [shape: f32[1], index: 0, kind: input, shape index: {}]   ;;  %s107_s1 = inlined_call_operand.<no memory space> [shape: f32[1], index: 1, kind: input, shape index: {}]   ;;  %s108_s2 = inlined_call_operand.vmem [shape: f32[1,128], index: 2, kind: input, shape index: {}]   ;;  %s109_s3 = inlined_call_operand.hbm [shape: f32[1,128], index: 3, kind: output, shape index: {}]  }
   0x1   :  { %v17_v0 = vld [vmem:[%s108_s2] sm:$0x1]  ;;  %v19_v1 = vstv %s106_s0  ;;  %v22_v2 = vstv %s107_s1 }
   0x2   :  { %10 = vsyncpa [#allocation5], 0  ;;  %v20_v3 = vmul.f32 %v19_v1, %v17_v0  ;;  %s64_s18 = smov [#allocation4]  }
   0x3   :  { %s31_s19 = sshll.u32 %s64_s18, 4  ;;  %s32_s19 = int_to_ptr.vmem [resolvable:$true] %s31_s19 }
   0x4   :  { %v23_v4 = vadd.f32 %v22_v2, %v20_v3  ;;  %s40_s20 = scalar_lea.vmem %s32_s19, 16  ;;  %s44_s21 = scalar_lea.vmem %s32_s19, 32 }
   0x5   :  { %p41_p0 = scmp.ne.s32.totalorder %s32_s19, %s40_s20  ;;  %p45_p1 = scmp.lt.s32.totalorder %s32_s19, %s32_s19 }
   0x6   :  { %24 = vst [vmem:[#allocation4] sm:$0x1] %v23_v4  ;;  %p46_p2 = scmp.lt.s32.totalorder %s44_s21, %s40_s20 }
   0x8   :  { %p47_p3 = por %p46_p2, %p45_p1 }
   0xa   :  { %p48_p4 = pnand %p47_p3, %p41_p0 }
   0xc   :  { %51 = shalt.err (!%p48_p4)
}
   0xd   :  { %s52_s22 = scalar_lea.hbm %s109_s3, 16 }
   0xe   :  { %p53_p5 = scmp.ne.s32.totalorder %s109_s3, %s52_s22  ;;  %p56_p6 = scmp.lt.u32.totalorder %s52_s22, %s109_s3 }
  0x10   :  { %p58_p7 = pnand %p56_p6, %p53_p5 }
  0x12   :  { %61 = shalt.err (!%p58_p7)
}
  0x13   :  { %34 = dma.vmem_to_hbm [thread:$0]  %s32_s19, 16, %s109_s3, [#allocation5]  }
  0x14   :  { %62 = dma.done.wait [#allocation5], 16  }
  0x15   :  { %63 = vsyncadd [#allocation5], 4294967280 }
  0x16   :  { %38 = vsyncpa [#allocation5], 1 }

</bundles_post_ra>
